<compile_context>
chip_gen: v5e
topology: v5e:2x2
jax: 0.10.0
libtpu: 0.0.40
codegen_flags: <defaults>
</compile_context>

<pallas_src>
import functools

import jax
import jax.numpy as jnp
from jax.experimental import pallas as pl
from jax.experimental.pallas import tpu as pltpu


def _round_up(x, m):
    return ((x + m - 1) // m) * m


def _pad2d(x, rows, cols):
    r, c = x.shape
    if r == rows and c == cols:
        return x
    return jnp.pad(x, ((0, rows - r), (0, cols - c)))


def _select_tiles(num_users, num_items, max_tile=512):
    # User axis sits on sublanes of the graph tile -> multiple of 16 (bf16 pack).
    tu = min(max_tile, _round_up(num_users, 16))
    up = _round_up(num_users, tu)
    # Item axis sits on lanes of the graph tile -> multiple of 128.
    ti = min(max_tile, _round_up(num_items, 128))
    ip = _round_up(num_items, ti)
    return up, tu, ip, ti


# ---------------------------------------------------------------------------
# Kernel 1: fused bipartite propagation layer.
#   new_u = R_hat   @ E_i      (Up x Ip) @ (Ip x D)
#   new_i = R_hat^T @ E_u      (Ip x Up) @ (Up x D)
# grid = (user tiles, item tiles).  The item axis is the reduction axis for
# new_u (output-resident per user tile); new_i lives in a persistent f32 VMEM
# accumulator spanning the whole grid and is written to HBM once at the end.
# ---------------------------------------------------------------------------
def _fused_layer_kernel(r_ref, eu_ref, ei_ref, u_out_ref, i_out_ref,
                        u_acc, i_acc, *, ti):
    iu = pl.program_id(0)          # user-tile index
    ik = pl.program_id(1)          # item-tile index
    nu = pl.num_programs(0)
    ni = pl.num_programs(1)

    @pl.when(ik == 0)
    def _():
        u_acc[...] = jnp.zeros_like(u_acc)

    @pl.when((iu == 0) & (ik == 0))
    def _():
        i_acc[...] = jnp.zeros_like(i_acc)

    r = r_ref[...]                                         # (TU, TI) bf16
    ks = pl.multiple_of(ik * ti, ti)

    # User side: new_u[iu] += R_tile @ E_i[ik]   (E_i resident, sliced in VMEM).
    u_acc[...] += jnp.dot(r, ei_ref[pl.ds(ks, ti), :],
                          preferred_element_type=jnp.float32)

    # Item side: new_i[ik] += R_tile^T @ E_u[iu] -- contract R's row axis so the
    # same graph tile serves both directions (no transposed graph copy in HBM).
    contrib = jax.lax.dot_general(
        r, eu_ref[...],
        dimension_numbers=(((0,), (0,)), ((), ())),
        preferred_element_type=jnp.float32)
    i_acc[pl.ds(ks, ti), :] += contrib

    @pl.when(ik == ni - 1)
    def _():
        u_out_ref[...] = u_acc[...].astype(u_out_ref.dtype)

    @pl.when((iu == nu - 1) & (ik == ni - 1))
    def _():
        i_out_ref[...] = i_acc[...].astype(i_out_ref.dtype)


def fused_propagate_layer(r_bf, eu_bf, ei_bf, *, tu, ti):
    up, ip = r_bf.shape
    d = eu_bf.shape[1]
    nu, ni = up // tu, ip // ti

    # Rough VMEM budget (double-buffered inputs/outputs + f32 scratch) with
    # headroom, capped at the smallest per-core physical budget (v7x: 64 MiB).
    est = (2 * tu * ti * 2          # graph tiles
           + 2 * tu * d * 2         # E_u row tiles
           + 2 * ip * d * 2         # E_i resident
           + 2 * tu * d * 2         # new_u out tiles
           + 2 * ip * d * 2         # new_i out (resident)
           + tu * d * 4 + ip * d * 4)   # f32 accumulators
    vmem_limit = int(min(64 * 1024 * 1024, max(32 * 1024 * 1024, 1.5 * est)))

    kernel = functools.partial(_fused_layer_kernel, ti=ti)
    new_u, new_i = pl.pallas_call(
        kernel,
        out_shape=(jax.ShapeDtypeStruct((up, d), jnp.bfloat16),
                   jax.ShapeDtypeStruct((ip, d), jnp.bfloat16)),
        grid_spec=pltpu.PrefetchScalarGridSpec(
            num_scalar_prefetch=0,
            grid=(nu, ni),
            in_specs=[
                pl.BlockSpec((tu, ti), lambda i, k: (i, k)),   # graph tile (streamed once)
                pl.BlockSpec((tu, d), lambda i, k: (i, 0)),    # E_u row tile
                pl.BlockSpec((ip, d), lambda i, k: (0, 0)),    # E_i resident in VMEM
            ],
            out_specs=[
                pl.BlockSpec((tu, d), lambda i, k: (i, 0)),    # new_u row tile
                pl.BlockSpec((ip, d), lambda i, k: (0, 0)),    # new_i (written at grid end)
            ],
            scratch_shapes=[
                pltpu.VMEM((tu, d), jnp.float32),              # user-side f32 accumulator
                pltpu.VMEM((ip, d), jnp.float32),              # item-side f32 accumulator
            ],
        ),
        compiler_params=pltpu.CompilerParams(
            # Resident item-side accumulator couples all user tiles -> no
            # megacore-parallel axis in the fused design.
            dimension_semantics=("arbitrary", "arbitrary"),
            vmem_limit_bytes=vmem_limit,
        ),
    )(r_bf, eu_bf, ei_bf)
    return new_u, new_i


# ---------------------------------------------------------------------------
# LightGCN.computer(): n_layers of propagation + mean over layers.
# ---------------------------------------------------------------------------
def lightgcn_propagate(r_hat, user_emb, item_emb, n_layers, *, max_tile=512):
    num_users, num_items = r_hat.shape
    d = user_emb.shape[1]
    up, tu, ip, ti = _select_tiles(num_users, num_items, max_tile)

    r_bf = _pad2d(r_hat, up, ip).astype(jnp.bfloat16)   # pad + cast graph ONCE
    eu0 = _pad2d(user_emb, up, d)                       # f32, padded once
    ei0 = _pad2d(item_emb, ip, d)

    acc_u, acc_i = eu0, ei0                             # layer-0 term (f32)
    cur_u = eu0.astype(jnp.bfloat16)
    cur_i = ei0.astype(jnp.bfloat16)
    for _ in range(n_layers):
        cur_u, cur_i = fused_propagate_layer(r_bf, cur_u, cur_i, tu=tu, ti=ti)
        acc_u = acc_u + cur_u.astype(jnp.float32)       # layer sum stays f32
        acc_i = acc_i + cur_i.astype(jnp.float32)
    inv = 1.0 / float(n_layers + 1)
    return (acc_u * inv)[:num_users], (acc_i * inv)[:num_items]


# ---------------------------------------------------------------------------
# Kernel 2: lane-dense batched inner product (LightGCN.forward epilogue).
#   gamma[b] = sum_d users_emb[b, d] * items_emb[b, d]
# Inputs presented as [D, B] (batch on lanes); output is a [1, B] slab.
# ---------------------------------------------------------------------------
def _inner_prod_kernel(u_ref, i_ref, o_ref):
    o_ref[...] = jnp.sum(u_ref[...] * i_ref[...], axis=0, keepdims=True)


def lightgcn_inner_product(users_emb, items_emb, *, tb=512):
    b, d = users_emb.shape
    tb = min(tb, _round_up(b, 128))
    bp = _round_up(b, tb)
    u_t = _pad2d(users_emb.T, d, bp)           # layout plumbing in the wrapper
    i_t = _pad2d(items_emb.T, d, bp)
    out = pl.pallas_call(
        _inner_prod_kernel,
        out_shape=jax.ShapeDtypeStruct((1, bp), jnp.float32),
        grid_spec=pltpu.PrefetchScalarGridSpec(
            num_scalar_prefetch=0,
            grid=(bp // tb,),
            in_specs=[
                pl.BlockSpec((d, tb), lambda i: (0, i)),
                pl.BlockSpec((d, tb), lambda i: (0, i)),
            ],
            out_specs=pl.BlockSpec((1, tb), lambda i: (0, i)),
        ),
        compiler_params=pltpu.CompilerParams(
            dimension_semantics=("parallel",)),
    )(u_t, i_t)
    return out[0, :b]


# ---------------------------------------------------------------------------
# Model glue (parameter init, graph construction, forward wrapper, reference)
# ---------------------------------------------------------------------------
def init_lightgcn_params(key, num_users, num_items, latent_dim):
    ku, ki = jax.random.split(key)
    # nn.init.normal_(..., std=0.1)
    user_emb = 0.1 * jax.random.normal(ku, (num_users, latent_dim), jnp.float32)
    item_emb = 0.1 * jax.random.normal(ki, (num_items, latent_dim), jnp.float32)
    return {"user_emb": user_emb, "item_emb": item_emb}


def build_norm_bipartite(key, num_users, num_items):
    """Dense stand-in for dataset.getSparseGraph(), kept in bipartite form:
       R_hat = D_u^-1/2 R D_i^-1/2 so that G = [[0, R_hat], [R_hat^T, 0]]."""
    R = (jax.random.uniform(key, (num_users, num_items)) < 0.3).astype(jnp.float32)
    deg_u = R.sum(axis=1)
    deg_i = R.sum(axis=0)
    du = jnp.where(deg_u > 0.0, 1.0 / jnp.sqrt(deg_u), 0.0)
    di = jnp.where(deg_i > 0.0, 1.0 / jnp.sqrt(deg_i), 0.0)
    return du[:, None] * R * di[None, :]


def lightgcn_forward(params, r_hat, users, items, *, n_layers):
    """Equivalent of LightGCN.forward(users, items) with dropout disabled."""
    all_users, all_items = lightgcn_propagate(
        r_hat, params["user_emb"], params["item_emb"], n_layers)
    users_emb = all_users[users]    # gather (glue, fused by XLA)
    items_emb = all_items[items]
    return lightgcn_inner_product(users_emb, items_emb)


def lightgcn_forward_ref(params, r_hat, users, items, *, n_layers):
    """Pure-JAX f32 reference of the PyTorch semantics (dense G @ E)."""
    U, I = r_hat.shape
    N = U + I
    G = jnp.zeros((N, N), jnp.float32)
    G = G.at[:U, U:].set(r_hat)
    G = G.at[U:, :U].set(r_hat.T)
    all_emb = jnp.concatenate([params["user_emb"], params["item_emb"]], axis=0)
    embs = [all_emb]
    cur = all_emb
    for _ in range(n_layers):
        cur = G @ cur
        embs.append(cur)
    light_out = jnp.mean(jnp.stack(embs, axis=1), axis=1)
    all_users = light_out[:U]
    all_items = light_out[U:]
    return jnp.sum(all_users[users] * all_items[items], axis=1)


if __name__ == "__main__":
    key = jax.random.PRNGKey(0)
    k_emb, k_graph, k_u, k_i = jax.random.split(key, 4)

    num_users, num_items, latent_dim, n_layers = 96, 160, 64, 3
    batch = 32

    params = init_lightgcn_params(k_emb, num_users, num_items, latent_dim)
    r_hat = build_norm_bipartite(k_graph, num_users, num_items)

    users = jax.random.randint(k_u, (batch,), 0, num_users, dtype=jnp.int32)
    items = jax.random.randint(k_i, (batch,), 0, num_items, dtype=jnp.int32)

    fwd = jax.jit(functools.partial(lightgcn_forward, n_layers=n_layers))
    gamma = jax.block_until_ready(fwd(params, r_hat, users, items))

    gamma_ref = lightgcn_forward_ref(params, r_hat, users, items, n_layers=n_layers)
    assert gamma.shape == (batch,)
    # bf16 graph + bf16 inter-layer state with f32 accumulation -> loosened
    # tolerance vs the pure-f32 reference.
    assert jnp.allclose(gamma, gamma_ref, atol=5e-2, rtol=5e-2), (
        gamma, gamma_ref, jnp.max(jnp.abs(gamma - gamma_ref)))

    print("KERNEL_OK")
</pallas_src>

<mosaic_0001>
module attributes {stable_mosaic.version = 11 : i64} {
  func.func @_fused_layer_kernel(%arg0: i32, %arg1: i32, %arg2: memref<96x256xbf16, #tpu.memory_space<vmem>>, %arg3: memref<96x64xbf16, #tpu.memory_space<vmem>>, %arg4: memref<256x64xbf16, #tpu.memory_space<vmem>>, %arg5: memref<96x64xbf16, #tpu.memory_space<vmem>>, %arg6: memref<256x64xbf16, #tpu.memory_space<vmem>>, %arg7: memref<96x64xf32, #tpu.memory_space<vmem>>, %arg8: memref<256x64xf32, #tpu.memory_space<vmem>>) attributes {dimension_semantics = [#tpu.dimension_semantics<arbitrary>, #tpu.dimension_semantics<arbitrary>], iteration_bounds = array<i64: 1, 1>, scalar_prefetch = 0 : i64, scratch_operands = 2 : i64, tpu.core_type = #tpu.core_type<tc>, window_params = [{transform_indices = @transform_0, window_bounds = array<i64: 96, 256>}, {transform_indices = @transform_1, window_bounds = array<i64: 96, 64>}, {pipeline_mode = #tpu.pipeline_mode<synchronous>, transform_indices = @transform_2, window_bounds = array<i64: 256, 64>}, {transform_indices = @transform_3, window_bounds = array<i64: 96, 64>}, {pipeline_mode = #tpu.pipeline_mode<synchronous>, transform_indices = @transform_4, window_bounds = array<i64: 256, 64>}]} {
    %c0_i32 = arith.constant 0 : i32
    %0 = arith.cmpi eq, %arg1, %c0_i32 : i32
    %1 = arith.extui %0 : i1 to i32
    %c0_i32_0 = arith.constant 0 : i32
    %2 = arith.cmpi ne, %1, %c0_i32_0 : i32
    scf.if %2 {
      %cst_20 = arith.constant 0.000000e+00 : f32
      %32 = vector.broadcast %cst_20 : f32 to vector<96x64xf32>
      %c0_21 = arith.constant 0 : index
      %c0_22 = arith.constant 0 : index
      %33 = vector.load %arg7[%c0_21, %c0_22] : memref<96x64xf32, #tpu.memory_space<vmem>>, vector<96x64xf32>
      tpu.vector_store %arg7[%c0_21, %c0_22], %32 {strides = array<i32>} : memref<96x64xf32, #tpu.memory_space<vmem>>, vector<96x64xf32>,
    } else {
    }
    %c0_i32_1 = arith.constant 0 : i32
    %3 = arith.cmpi eq, %arg0, %c0_i32_1 : i32
    %c0_i32_2 = arith.constant 0 : i32
    %4 = arith.cmpi eq, %arg1, %c0_i32_2 : i32
    %5 = arith.andi %3, %4 : i1
    %6 = arith.extui %5 : i1 to i32
    %c0_i32_3 = arith.constant 0 : i32
    %7 = arith.cmpi ne, %6, %c0_i32_3 : i32
    scf.if %7 {
      %cst_20 = arith.constant 0.000000e+00 : f32
      %32 = vector.broadcast %cst_20 : f32 to vector<256x64xf32>
      %c0_21 = arith.constant 0 : index
      %c0_22 = arith.constant 0 : index
      %33 = vector.load %arg8[%c0_21, %c0_22] : memref<256x64xf32, #tpu.memory_space<vmem>>, vector<256x64xf32>
      tpu.vector_store %arg8[%c0_21, %c0_22], %32 {strides = array<i32>} : memref<256x64xf32, #tpu.memory_space<vmem>>, vector<256x64xf32>,
    } else {
    }
    %c0 = arith.constant 0 : index
    %c0_4 = arith.constant 0 : index
    %8 = vector.load %arg2[%c0, %c0_4] : memref<96x256xbf16, #tpu.memory_space<vmem>>, vector<96x256xbf16>
    %c256_i32 = arith.constant 256 : i32
    %9 = arith.muli %arg1, %c256_i32 : i32
    %10 = tpu.assume_multiple %9, 256 : i32
    %c0_5 = arith.constant 0 : index
    %c0_6 = arith.constant 0 : index
    %11 = vector.load %arg7[%c0_5, %c0_6] : memref<96x64xf32, #tpu.memory_space<vmem>>, vector<96x64xf32>
    %12 = arith.index_cast %10 : i32 to index
    %c0_7 = arith.constant 0 : index
    %13 = vector.load %arg4[%12, %c0_7] : memref<256x64xbf16, #tpu.memory_space<vmem>>, vector<256x64xbf16>
    %cst = arith.constant dense<0.000000e+00> : vector<96x64xf32>
    %14 = tpu.matmul %8, %13, %cst {dimension_numbers = #tpu.dot_dimension_numbers<[1], [0], [0], [1], [0, 0, 1, 1], [], []>} : vector<96x256xbf16>, vector<256x64xbf16>, vector<96x64xf32> -> vector<96x64xf32>
    %15 = arith.addf %11, %14 : vector<96x64xf32>
    %c0_8 = arith.constant 0 : index
    %c0_9 = arith.constant 0 : index
    %16 = vector.load %arg7[%c0_8, %c0_9] : memref<96x64xf32, #tpu.memory_space<vmem>>, vector<96x64xf32>
    tpu.vector_store %arg7[%c0_8, %c0_9], %15 {strides = array<i32>} : memref<96x64xf32, #tpu.memory_space<vmem>>, vector<96x64xf32>,
    %c0_10 = arith.constant 0 : index
    %c0_11 = arith.constant 0 : index
    %17 = vector.load %arg3[%c0_10, %c0_11] : memref<96x64xbf16, #tpu.memory_space<vmem>>, vector<96x64xbf16>
    %cst_12 = arith.constant dense<0.000000e+00> : vector<256x64xf32>
    %18 = tpu.matmul %8, %17, %cst_12 {dimension_numbers = #tpu.dot_dimension_numbers<[0], [0], [1], [1], [0, 1, 1, 1], [], []>} : vector<96x256xbf16>, vector<96x64xbf16>, vector<256x64xf32> -> vector<256x64xf32>
    %19 = arith.index_cast %10 : i32 to index
    %c0_13 = arith.constant 0 : index
    %20 = vector.load %arg8[%19, %c0_13] : memref<256x64xf32, #tpu.memory_space<vmem>>, vector<256x64xf32>
    %21 = arith.addf %20, %18 : vector<256x64xf32>
    %22 = arith.index_cast %10 : i32 to index
    %c0_14 = arith.constant 0 : index
    %23 = vector.load %arg8[%22, %c0_14] : memref<256x64xf32, #tpu.memory_space<vmem>>, vector<256x64xf32>
    tpu.vector_store %arg8[%22, %c0_14], %21 {strides = array<i32>} : memref<256x64xf32, #tpu.memory_space<vmem>>, vector<256x64xf32>,
    %c0_i32_15 = arith.constant 0 : i32
    %24 = arith.cmpi eq, %arg1, %c0_i32_15 : i32
    %25 = arith.extui %24 : i1 to i32
    %c0_i32_16 = arith.constant 0 : i32
    %26 = arith.cmpi ne, %25, %c0_i32_16 : i32
    scf.if %26 {
      %c0_20 = arith.constant 0 : index
      %c0_21 = arith.constant 0 : index
      %32 = vector.load %arg7[%c0_20, %c0_21] : memref<96x64xf32, #tpu.memory_space<vmem>>, vector<96x64xf32>
      %33 = arith.truncf %32 : vector<96x64xf32> to vector<96x64xbf16>
      %c0_22 = arith.constant 0 : index
      %c0_23 = arith.constant 0 : index
      %34 = vector.load %arg5[%c0_22, %c0_23] : memref<96x64xbf16, #tpu.memory_space<vmem>>, vector<96x64xbf16>
      tpu.vector_store %arg5[%c0_22, %c0_23], %33 {strides = array<i32>} : memref<96x64xbf16, #tpu.memory_space<vmem>>, vector<96x64xbf16>,
    } else {
    }
    %c0_i32_17 = arith.constant 0 : i32
    %27 = arith.cmpi eq, %arg0, %c0_i32_17 : i32
    %c0_i32_18 = arith.constant 0 : i32
    %28 = arith.cmpi eq, %arg1, %c0_i32_18 : i32
    %29 = arith.andi %27, %28 : i1
    %30 = arith.extui %29 : i1 to i32
    %c0_i32_19 = arith.constant 0 : i32
    %31 = arith.cmpi ne, %30, %c0_i32_19 : i32
    scf.if %31 {
      %c0_20 = arith.constant 0 : index
      %c0_21 = arith.constant 0 : index
      %32 = vector.load %arg8[%c0_20, %c0_21] : memref<256x64xf32, #tpu.memory_space<vmem>>, vector<256x64xf32>
      %33 = arith.truncf %32 : vector<256x64xf32> to vector<256x64xbf16>
      %c0_22 = arith.constant 0 : index
      %c0_23 = arith.constant 0 : index
      %34 = vector.load %arg6[%c0_22, %c0_23] : memref<256x64xbf16, #tpu.memory_space<vmem>>, vector<256x64xbf16>
      tpu.vector_store %arg6[%c0_22, %c0_23], %33 {strides = array<i32>} : memref<256x64xbf16, #tpu.memory_space<vmem>>, vector<256x64xbf16>,
    } else {
    }
    return
  }
  func.func @transform_0(%arg0: i32, %arg1: i32) -> (i32, i32) {
    %c0_i32 = arith.constant 0 : i32
    return %arg0, %arg1 : i32, i32
  }
  func.func @transform_1(%arg0: i32, %arg1: i32) -> (i32, i32) {
    %c0_i32 = arith.constant 0 : i32
    %c0_i32_0 = arith.constant 0 : i32
    return %arg0, %c0_i32 : i32, i32
  }
  func.func @transform_2(%arg0: i32, %arg1: i32) -> (i32, i32) {
    %c0_i32 = arith.constant 0 : i32
    %c0_i32_0 = arith.constant 0 : i32
    %c0_i32_1 = arith.constant 0 : i32
    return %c0_i32, %c0_i32_0 : i32, i32
  }
  func.func @transform_3(%arg0: i32, %arg1: i32) -> (i32, i32) {
    %c0_i32 = arith.constant 0 : i32
    %c0_i32_0 = arith.constant 0 : i32
    return %arg0, %c0_i32 : i32, i32
  }
  func.func @transform_4(%arg0: i32, %arg1: i32) -> (i32, i32) {
    %c0_i32 = arith.constant 0 : i32
    %c0_i32_0 = arith.constant 0 : i32
    %c0_i32_1 = arith.constant 0 : i32
    return %c0_i32, %c0_i32_0 : i32, i32
  }
}

module attributes {stable_mosaic.version = 11 : i64} {
  func.func @_inner_prod_kernel(%arg0: i32, %arg1: memref<64x128xf32, #tpu.memory_space<vmem>>, %arg2: memref<64x128xf32, #tpu.memory_space<vmem>>, %arg3: memref<1x128xf32, #tpu.memory_space<vmem>>) attributes {dimension_semantics = [#tpu.dimension_semantics<parallel>], iteration_bounds = array<i64: 1>, scalar_prefetch = 0 : i64, scratch_operands = 0 : i64, tpu.core_type = #tpu.core_type<tc>, window_params = [{transform_indices = @transform_0, window_bounds = array<i64: 64, 128>}, {transform_indices = @transform_1, window_bounds = array<i64: 64, 128>}, {transform_indices = @transform_2, window_bounds = array<i64: 1, 128>}]} {
    %c0 = arith.constant 0 : index
    %c0_0 = arith.constant 0 : index
    %0 = vector.load %arg1[%c0, %c0_0] : memref<64x128xf32, #tpu.memory_space<vmem>>, vector<64x128xf32>
    %c0_1 = arith.constant 0 : index
    %c0_2 = arith.constant 0 : index
    %1 = vector.load %arg2[%c0_1, %c0_2] : memref<64x128xf32, #tpu.memory_space<vmem>>, vector<64x128xf32>
    %2 = arith.mulf %0, %1 : vector<64x128xf32>
    %cst = arith.constant dense<0.000000e+00> : vector<128xf32>
    %3 = vector.multi_reduction <add>, %2, %cst [0] : vector<64x128xf32> to vector<128xf32>
    %4 = vector.shape_cast %3 : vector<128xf32> to vector<1x128xf32>
    %c0_3 = arith.constant 0 : index
    %c0_4 = arith.constant 0 : index
    %5 = vector.load %arg3[%c0_3, %c0_4] : memref<1x128xf32, #tpu.memory_space<vmem>>, vector<1x128xf32>
    tpu.vector_store %arg3[%c0_3, %c0_4], %4 {strides = array<i32>} : memref<1x128xf32, #tpu.memory_space<vmem>>, vector<1x128xf32>,
    return
  }
  func.func @transform_0(%arg0: i32) -> (i32, i32) {
    %c0_i32 = arith.constant 0 : i32
    %c0_i32_0 = arith.constant 0 : i32
    return %c0_i32, %arg0 : i32, i32
  }
  func.func @transform_1(%arg0: i32) -> (i32, i32) {
    %c0_i32 = arith.constant 0 : i32
    %c0_i32_0 = arith.constant 0 : i32
    return %c0_i32, %arg0 : i32, i32
  }
  func.func @transform_2(%arg0: i32) -> (i32, i32) {
    %c0_i32 = arith.constant 0 : i32
    %c0_i32_0 = arith.constant 0 : i32
    return %c0_i32, %arg0 : i32, i32
  }
}

</mosaic_0001>

<bundles_post_ra>
// kernel: lightgcn_forward.7
= control target key start
LH: loop header
LB: loop body
LE: loop exit
PB: predicated region body
PF: predicated region fallthrough
CT: control target
= control target key end

     0   :  { %s119_s0 = inlined_call_operand.vmem [shape: f32[64,128], index: 0, kind: input, shape index: {}]   ;;  %s120_s1 = inlined_call_operand.vmem [shape: f32[64,128], index: 1, kind: input, shape index: {}]   ;;  %s121_s2 = inlined_call_operand.vmem [shape: f32[1,128], index: 2, kind: output, shape index: {}]  }
   0x1   :  { %v11_v0 = vld [vmem:[%s119_s0] sm:$0xff]  ;;  %v12_v1 = vld [vmem:[%s119_s0 + $0x8] sm:$0xff]  ;;  %v13_v2 = vld [vmem:[%s119_s0 + $0x10] sm:$0xff] }
   0x2   :  { %v14_v3 = vld [vmem:[%s119_s0 + $0x18] sm:$0xff]  ;;  %v19_v4 = vld [vmem:[%s120_s1] sm:$0xff]  ;;  %v20_v5 = vld [vmem:[%s120_s1 + $0x8] sm:$0xff] }
   0x3   :  { %v21_v6 = vld [vmem:[%s120_s1 + $0x10] sm:$0xff]  ;;  %v22_v7 = vld [vmem:[%s120_s1 + $0x18] sm:$0xff]  ;;  %v27_v8 = vmul.f32 %v19_v4, %v11_v0  ;;  %v28_v9 = vmul.f32 %v20_v5, %v12_v1  ;;  %v15_v11 = vld [vmem:[%s119_s0 + $0x20] sm:$0xff] }
   0x4   :  { %v29_v10 = vmul.f32 %v21_v6, %v13_v2  ;;  %v23_v12 = vld [vmem:[%s120_s1 + $0x20] sm:$0xff]  ;;  %v30_v13 = vmul.f32 %v22_v7, %v14_v3  ;;  %v16_v15 = vld [vmem:[%s119_s0 + $0x28] sm:$0xff]  ;;  %v17_v19 = vld [vmem:[%s119_s0 + $0x30] sm:$0xff] }
   0x5   :  { %v35_v14 = vadd.f32 %v28_v9, %v27_v8  ;;  %v24_v16 = vld [vmem:[%s120_s1 + $0x28] sm:$0xff]  ;;  %v31_v17 = vmul.f32 %v23_v12, %v15_v11  ;;  %v25_v20 = vld [vmem:[%s120_s1 + $0x30] sm:$0xff]  ;;  %v18_v23 = vld [vmem:[%s119_s0 + $0x38] sm:$0xff] }
   0x6   :  { %v32_v21 = vmul.f32 %v24_v16, %v16_v15  ;;  %v26_v24 = vld [vmem:[%s120_s1 + $0x38] sm:$0xff]  ;;  %v33_v25 = vmul.f32 %v25_v20, %v17_v19 }
   0x7   :  { %v36_v18 = vadd.f32 %v35_v14, %v29_v10  ;;  %v34_v27 = vmul.f32 %v26_v24, %v18_v23 }
   0x9   :  { %v37_v22 = vadd.f32 %v36_v18, %v30_v13 }
   0xb   :  { %v38_v26 = vadd.f32 %v37_v22, %v31_v17 }
   0xd   :  { %v39_v28 = vadd.f32 %v38_v26, %v32_v21 }
   0xf   :  { %v40_v29 = vadd.f32 %v39_v28, %v33_v25 }
  0x11   :  { %v41_v30 = vadd.f32 %v40_v29, %v34_v27 }
  0x13   :  { %v42_v31 = vrot.slane %v41_v30, 4 }
  0x15   :  { %v43_v32 = vadd.f32 %v42_v31, %v41_v30 }
  0x17   :  { %v44_v33 = vrot.slane %v43_v32, 2 }
  0x19   :  { %v45_v34 = vadd.f32 %v44_v33, %v43_v32 }
  0x1b   :  { %v46_v35 = vrot.slane %v45_v34, 1 }
  0x1d   :  { %v47_v36 = vadd.f32 %v46_v35, %v45_v34 }
  0x1f   :  { %48 = vst [vmem:[%s121_s2] sm:$0x1] %v47_v36 }

// kernel: lightgcn_forward.4
= control target key start
LH: loop header
LB: loop body
LE: loop exit
PB: predicated region body
PF: predicated region fallthrough
CT: control target
= control target key end

     0   :  { %vm464_vm0 = vcmask 785408   ;;  %vm21_vm1 = vcmask 523264   ;;  %vm726_vm2 = vcmask 519168   ;;  %s1534_s0 = inlined_call_operand.vmem [shape: bf16[96,256], index: 0, kind: input, shape index: {}]   ;;  %s1535_s1 = inlined_call_operand.vmem [shape: bf16[96,64], index: 1, kind: input, shape index: {}]   ;;  %s1536_s2 = inlined_call_operand.vmem [shape: bf16[256,64], index: 2, kind: input, shape index: {}]   ;;  %s1537_s4 = inlined_call_operand.vmem [shape: bf16[256,64], index: 4, kind: output, shape index: {1}]   ;;  %s1538_s3 = inlined_call_operand.vmem [shape: bf16[96,64], index: 3, kind: output, shape index: {0}]  }
   0x1   :  { %v1000_v0 = vld [vmem:[%s1534_s0 + $0x4] sm:$0xf]  ;;  %v850_v1 = vld [vmem:[%s1534_s0] sm:$0xf]  ;;  %v852_v2 = vld [vmem:[%s1534_s0 + $0x8] sm:$0xf0] }
   0x2   :  { %v1001_v3 = vld [vmem:[%s1534_s0 + $0x4] sm:$0xf0]  ;;  %v1080_v4 = vor.u32 %v1000_v0, %v852_v2  ;;  %v1002_v6 = vld [vmem:[%s1534_s0 + $0x14] sm:$0xf]  ;;  %v858_v7 = vld [vmem:[%s1534_s0 + $0x10] sm:$0xf] }
   0x3   :  { %v1082_v5 = vor.u32 %v1001_v3, %v850_v1  ;;  %v860_v8 = vld [vmem:[%s1534_s0 + $0x18] sm:$0xf0]  ;;  %v1003_v9 = vld [vmem:[%s1534_s0 + $0x14] sm:$0xf0]  ;;  %v1004_v12 = vld [vmem:[%s1534_s0 + $0x24] sm:$0xf] }
   0x4   :  { %v1098_v10 = vor.u32 %v1003_v9, %v858_v7  ;;  %v1100_v11 = vor.u32 %v1002_v6, %v860_v8  ;;  %v866_v13 = vld [vmem:[%s1534_s0 + $0x20] sm:$0xf]  ;;  %v868_v14 = vld [vmem:[%s1534_s0 + $0x28] sm:$0xf0]  ;;  %v1005_v15 = vld [vmem:[%s1534_s0 + $0x24] sm:$0xf0] }
   0x5   :  { %404 = vxpose.binary.xlu0.c.b16.start [1/12] (short) %v1080_v4, %v1082_v5, 128  ;;  %v1116_v16 = vor.u32 %v1005_v15, %v866_v13  ;;  %v1118_v17 = vor.u32 %v1004_v12, %v868_v14  ;;  %v1006_v18 = vld [vmem:[%s1534_s0 + $0x34] sm:$0xf]  ;;  %v874_v19 = vld [vmem:[%s1534_s0 + $0x30] sm:$0xf]  ;;  %v876_v20 = vld [vmem:[%s1534_s0 + $0x38] sm:$0xf0] }
   0x6   :  { %v1007_v21 = vld [vmem:[%s1534_s0 + $0x34] sm:$0xf0]  ;;  %v1136_v23 = vor.u32 %v1006_v18, %v876_v20  ;;  %v1033_v24 = vld [vmem:[%s1535_s1 + $0x28] sm:$0xff]  ;;  %v1032_v25 = vld [vmem:[%s1535_s1 + $0x20] sm:$0xff]  ;;  %v1042_v6 = vmov 0.0  }
   0x7   :  { %v1134_v22 = vor.u32 %v1007_v21, %v874_v19  ;;  %515 = vmatpush.bf16.msra.mxu2 %v1033_v24  ;;  %1034 = vmatpush.bf16.msra.mxu3 %v1033_v24  ;;  %v1031_v26 = vld [vmem:[%s1535_s1 + $0x18] sm:$0xff]  ;;  %v1008_v27 = vld [vmem:[%s1534_s0 + $0x44] sm:$0xf]  ;;  %v882_v28 = vld [vmem:[%s1534_s0 + $0x40] sm:$0xf]  ;;  %40 = vst.msk [vmem:[#allocation3] sm:$0xff] %vm21_vm1, %v1042_v6 }
   0x8   :  { %v884_v29 = vld [vmem:[%s1534_s0 + $0x48] sm:$0xf0]  ;;  %v1009_v30 = vld [vmem:[%s1534_s0 + $0x44] sm:$0xf0]  ;;  %v1030_v31 = vld [vmem:[%s1535_s1 + $0x10] sm:$0xff]  ;;  %22 = vst.msk [vmem:[#allocation2] sm:$0xff] %vm21_vm1, %v1042_v6 }
   0x9   :  { %v1164_v32 = vor.u32 %v1009_v30, %v882_v28  ;;  %v1166_v33 = vor.u32 %v1008_v27, %v884_v29  ;;  %v1029_v34 = vld [vmem:[%s1535_s1 + $0x8] sm:$0xff]  ;;  %v1028_v35 = vld [vmem:[%s1535_s1] sm:$0xff]  ;;  %v1010_v36 = vld [vmem:[%s1534_s0 + $0x54] sm:$0xf]  ;;  %23 = vst.msk [vmem:[#allocation2 + $0x8] sm:$0xff] %vm21_vm1, %v1042_v6 }
   0xa   :  { %v890_v37 = vld [vmem:[%s1534_s0 + $0x50] sm:$0xf]  ;;  %v892_v38 = vld [vmem:[%s1534_s0 + $0x58] sm:$0xf0]  ;;  %v1011_v39 = vld [vmem:[%s1534_s0 + $0x54] sm:$0xf0] }
   0xb   :  { %516 = vmatpush.bf16.msra.mxu2 %v1032_v25  ;;  %1035 = vmatpush.bf16.msra.mxu3 %v1032_v25  ;;  %v1188_v40 = vor.u32 %v1011_v39, %v890_v37  ;;  %v1190_v41 = vor.u32 %v1010_v36, %v892_v38  ;;  %v1019_v42 = vld [vmem:[%s1536_s2 + $0x38] sm:$0xff]  ;;  %v1018_v44 = vld [vmem:[%s1536_s2 + $0x30] sm:$0xff]  ;;  %v1017_v46 = vld [vmem:[%s1536_s2 + $0x28] sm:$0xff]  ;;  %24 = vst.msk [vmem:[#allocation2 + $0x10] sm:$0xff] %vm21_vm1, %v1042_v6 }
   0xc   :  { %v1027_v43 = vld [vmem:[%s1536_s2 + $0x78] sm:$0xff]  ;;  %289 = vmatpush.bf16.msra.mxu0 %v1019_v42  ;;  %v1026_v45 = vld [vmem:[%s1536_s2 + $0x70] sm:$0xff]  ;;  %v1025_v47 = vld [vmem:[%s1536_s2 + $0x68] sm:$0xff]  ;;  %25 = vst.msk [vmem:[#allocation2 + $0x18] sm:$0xff] %vm21_vm1, %v1042_v6 }
   0xd   :  { %328 = vmatpush.bf16.msra.mxu1 %v1027_v43  ;;  %v1016_v48 = vld [vmem:[%s1536_s2 + $0x20] sm:$0xff]  ;;  %v1015_v50 = vld [vmem:[%s1536_s2 + $0x18] sm:$0xff]  ;;  %v1014_v52 = vld [vmem:[%s1536_s2 + $0x10] sm:$0xff]  ;;  %26 = vst.msk [vmem:[#allocation2 + $0x20] sm:$0xff] %vm21_vm1, %v1042_v6 }
   0xe   :  { %v1024_v49 = vld [vmem:[%s1536_s2 + $0x60] sm:$0xff]  ;;  %v1023_v51 = vld [vmem:[%s1536_s2 + $0x58] sm:$0xff]  ;;  %v1022_v53 = vld [vmem:[%s1536_s2 + $0x50] sm:$0xff]  ;;  %27 = vst.msk [vmem:[#allocation2 + $0x28] sm:$0xff] %vm21_vm1, %v1042_v6 }
   0xf   :  { %517 = vmatpush.bf16.msra.mxu2 %v1031_v26  ;;  %1036 = vmatpush.bf16.msra.mxu3 %v1031_v26  ;;  %v1013_v54 = vld [vmem:[%s1536_s2 + $0x8] sm:$0xff]  ;;  %v1012_v57 = vld [vmem:[%s1536_s2] sm:$0xff]  ;;  %28 = vst.msk [vmem:[#allocation2 + $0x30] sm:$0xff] %vm21_vm1, %v1042_v6 }
  0x10   :  { %290 = vmatpush.bf16.msra.mxu0 %v1018_v44  ;;  %v1021_v55 = vld [vmem:[%s1536_s2 + $0x48] sm:$0xff]  ;;  %v1020_v58 = vld [vmem:[%s1536_s2 + $0x40] sm:$0xff]  ;;  %29 = vst.msk [vmem:[#allocation2 + $0x38] sm:$0xff] %vm21_vm1, %v1042_v6 }
  0x11   :  { %329 = vmatpush.bf16.msra.mxu1 %v1026_v45  ;;  %30 = vst.msk [vmem:[#allocation2 + $0x40] sm:$0xff] %vm21_vm1, %v1042_v6  ;;  %v85_v18 = vld [vmem:[#allocation2] sm:$0xff]  ;;  %v86_v28 = vld [vmem:[#allocation2 + $0x8] sm:$0xff] }
  0x12   :  { %31 = vst.msk [vmem:[#allocation2 + $0x48] sm:$0xff] %vm21_vm1, %v1042_v6 }
  0x13   :  { %518 = vmatpush.bf16.msra.mxu2 %v1030_v31  ;;  %1037 = vmatpush.bf16.msra.mxu3 %v1030_v31  ;;  %32 = vst.msk [vmem:[#allocation2 + $0x50] sm:$0xff] %vm21_vm1, %v1042_v6 }
  0x14   :  { %291 = vmatpush.bf16.msra.mxu0 %v1017_v46  ;;  %33 = vst.msk [vmem:[#allocation2 + $0x58] sm:$0xff] %vm21_vm1, %v1042_v6 }
  0x15   :  { %405 = vxpose.binary.xlu0.c.b16.cont [2/12] (short) %v1100_v11, %v1098_v10, 128  ;;  %41 = vst.msk [vmem:[#allocation3 + $0x8] sm:$0xff] %vm21_vm1, %v1042_v6 }
  0x16   :  { %330 = vmatpush.bf16.msra.mxu1 %v1025_v47  ;;  %42 = vst.msk [vmem:[#allocation3 + $0x10] sm:$0xff] %vm21_vm1, %v1042_v6 }
  0x17   :  { %519 = vmatpush.bf16.msra.mxu2 %v1029_v34  ;;  %1038 = vmatpush.bf16.msra.mxu3 %v1029_v34  ;;  %43 = vst.msk [vmem:[#allocation3 + $0x18] sm:$0xff] %vm21_vm1, %v1042_v6 }
  0x18   :  { %292 = vmatpush.bf16.msra.mxu0 %v1016_v48  ;;  %44 = vst.msk [vmem:[#allocation3 + $0x20] sm:$0xff] %vm21_vm1, %v1042_v6 }
  0x19   :  { %45 = vst.msk [vmem:[#allocation3 + $0x28] sm:$0xff] %vm21_vm1, %v1042_v6 }
  0x1a   :  { %331 = vmatpush.bf16.msra.mxu1 %v1024_v49  ;;  %46 = vst.msk [vmem:[#allocation3 + $0x30] sm:$0xff] %vm21_vm1, %v1042_v6 }
  0x1b   :  { %520 = vmatpush.bf16.msra.mxu2 %v1028_v35  ;;  %1039 = vmatpush.bf16.msra.mxu3 %v1028_v35  ;;  %47 = vst.msk [vmem:[#allocation3 + $0x38] sm:$0xff] %vm21_vm1, %v1042_v6 }
  0x1c   :  { %293 = vmatpush.bf16.msra.mxu0 %v1015_v50  ;;  %48 = vst.msk [vmem:[#allocation3 + $0x40] sm:$0xff] %vm21_vm1, %v1042_v6  ;;  %v87_v50 = vld [vmem:[#allocation2 + $0x10] sm:$0xff] }
  0x1d   :  { %49 = vst.msk [vmem:[#allocation3 + $0x48] sm:$0xff] %vm21_vm1, %v1042_v6 }
  0x1e   :  { %332 = vmatpush.bf16.msra.mxu1 %v1023_v51  ;;  %50 = vst.msk [vmem:[#allocation3 + $0x50] sm:$0xff] %vm21_vm1, %v1042_v6  ;;  %v606_v47 = vld [vmem:[#allocation3 + $0x18] sm:$0xff] }
  0x1f   :  { %51 = vst.msk [vmem:[#allocation3 + $0x58] sm:$0xff] %vm21_vm1, %v1042_v6 }
  0x20   :  { %294 = vmatpush.bf16.msra.mxu0 %v1014_v52  ;;  %52 = vst.msk [vmem:[#allocation3 + $0x60] sm:$0xff] %vm21_vm1, %v1042_v6 }
  0x21   :  { %53 = vst.msk [vmem:[#allocation3 + $0x68] sm:$0xff] %vm21_vm1, %v1042_v6 }
  0x22   :  { %333 = vmatpush.bf16.msra.mxu1 %v1022_v53  ;;  %54 = vst.msk [vmem:[#allocation3 + $0x70] sm:$0xff] %vm21_vm1, %v1042_v6 }
  0x23   :  { %55 = vst.msk [vmem:[#allocation3 + $0x78] sm:$0xff] %vm21_vm1, %v1042_v6 }
  0x24   :  { %295 = vmatpush.bf16.msra.mxu0 %v1013_v54  ;;  %56 = vst.msk [vmem:[#allocation3 + $0x80] sm:$0xff] %vm21_vm1, %v1042_v6 }
  0x25   :  { %406 = vxpose.binary.xlu0.c.b16.cont [3/12] (short) %v1118_v17, %v1116_v16, 128  ;;  %57 = vst.msk [vmem:[#allocation3 + $0x88] sm:$0xff] %vm21_vm1, %v1042_v6 }
  0x26   :  { %334 = vmatpush.bf16.msra.mxu1 %v1021_v55  ;;  %58 = vst.msk [vmem:[#allocation3 + $0x90] sm:$0xff] %vm21_vm1, %v1042_v6 }
  0x27   :  { %59 = vst.msk [vmem:[#allocation3 + $0x98] sm:$0xff] %vm21_vm1, %v1042_v6 }
  0x28   :  { %296 = vmatpush.bf16.msra.mxu0 %v1012_v57  ;;  %60 = vst.msk [vmem:[#allocation3 + $0xa0] sm:$0xff] %vm21_vm1, %v1042_v6 }
  0x29   :  { %61 = vst.msk [vmem:[#allocation3 + $0xa8] sm:$0xff] %vm21_vm1, %v1042_v6 }
  0x2a   :  { %335 = vmatpush.bf16.msra.mxu1 %v1020_v58  ;;  %62 = vst.msk [vmem:[#allocation3 + $0xb0] sm:$0xff] %vm21_vm1, %v1042_v6 }
  0x2b   :  { %297 = vmatmul.bf16.vlgmr.msra.gmra.mxu0 %v1082_v5  ;;  %63 = vst.msk [vmem:[#allocation3 + $0xb8] sm:$0xff] %vm21_vm1, %v1042_v6 }
  0x2c   :  { %64 = vst.msk [vmem:[#allocation3 + $0xc0] sm:$0xff] %vm21_vm1, %v1042_v6 }
  0x2d   :  { %336 = vmatmul.bf16.vlgmr.msra.gmra.mxu1 %v1080_v4  ;;  %65 = vst.msk [vmem:[#allocation3 + $0xc8] sm:$0xff] %vm21_vm1, %v1042_v6  ;;  %v621_v48 = vld [vmem:[#allocation3 + $0x90] sm:$0xff] }
  0x2e   :  { %66 = vst.msk [vmem:[#allocation3 + $0xd0] sm:$0xff] %vm21_vm1, %v1042_v6 }
  0x2f   :  { %67 = vst.msk [vmem:[#allocation3 + $0xd8] sm:$0xff] %vm21_vm1, %v1042_v6 }
  0x30   :  { %68 = vst.msk [vmem:[#allocation3 + $0xe0] sm:$0xff] %vm21_vm1, %v1042_v6 }
  0x31   :  { %69 = vst.msk [vmem:[#allocation3 + $0xe8] sm:$0xff] %vm21_vm1, %v1042_v6 }
  0x32   :  { %70 = vst.msk [vmem:[#allocation3 + $0xf0] sm:$0xff] %vm21_vm1, %v1042_v6 }
  0x33   :  { %71 = vst.msk [vmem:[#allocation3 + $0xf8] sm:$0xff] %vm21_vm1, %v1042_v6 }
  0x35   :  { %407 = vxpose.binary.xlu0.c.b16.cont [4/12] (short) %v1136_v23, %v1134_v22, 128 }
  0x3b   :  { %302 = vmatmul.bf16.gmra.mxu0 %v1098_v10 }
  0x3d   :  { %341 = vmatmul.bf16.gmra.mxu1 %v1100_v11  ;;  %v603_v11 = vld [vmem:[#allocation3] sm:$0xff] }
  0x45   :  { %408 = vxpose.binary.xlu0.c.b16.cont [5/12] (short) %v1166_v33, %v1164_v32, 128 }
  0x4b   :  { %307 = vmatmul.bf16.gmra.mxu0 %v1116_v16  ;;  %v604_v16 = vld [vmem:[#allocation3 + $0x8] sm:$0xff] }
  0x4d   :  { %346 = vmatmul.bf16.gmra.mxu1 %v1118_v17  ;;  %v619_v17 = vld [vmem:[#allocation3 + $0x80] sm:$0xff] }
  0x55   :  { %409 = vxpose.binary.xlu0.c.b16.end [6/12] (short) %v1190_v41, %v1188_v40, 128 }
  0x5b   :  { %312 = vmatmul.bf16.gmra.mxu0 %v1134_v22 }
  0x5d   :  { %351 = vmatmul.bf16.gmra.mxu1 %v1136_v23 }
  0x6b   :  { %317 = vmatmul.bf16.gmra.mxu0 %v1164_v32  ;;  %v605_v32 = vld [vmem:[#allocation3 + $0x10] sm:$0xff] }
  0x6d   :  { %356 = vmatmul.bf16.gmra.mxu1 %v1166_v33  ;;  %v620_v33 = vld [vmem:[#allocation3 + $0x88] sm:$0xff] }
  0x7b   :  { %322 = vmatmul.bf16.gmra.mxu0 %v1188_v40 }
  0x7d   :  { %361 = vmatmul.bf16.gmra.mxu1 %v1190_v41 }
  0xa8   :  { %v298_v12 = vpop.f32.mrf.mxu0 }
  0xaa   :  { %v337_v13 = vpop.f32.mrf.mxu1 }
  0xab   :  { %v338_v19 = vadd.f32 %v337_v13, %v298_v12 }
  0xad   :  { %v367_v24 = vadd.f32 %v338_v19, %v85_v18  ;;  %v89_v19 = vld [vmem:[#allocation2 + $0x20] sm:$0xff] }
  0xaf   :  { %380 = vst.msk [vmem:[#allocation2] sm:$0xff] %vm21_vm1, %v367_v24 }
  0xb0   :  { %v300_v20 = vpop.f32.mrf.mxu0 }
  0xb1   :  { %v412_v56 = vpop.trf.xlu0 }
  0xb2   :  { %984 = vmatmul.msk.bf16.vlgmr.msra.gmra.mxu2 %vm464_vm0, %v412_v56  ;;  %v339_v21 = vpop.f32.mrf.mxu1 }
  0xb3   :  { %v340_v25 = vadd.f32 %v339_v21, %v300_v20 }
  0xb5   :  { %v368_v30 = vadd.f32 %v340_v25, %v86_v28 }
  0xb6   :  { %v702_v40 = vld [vmem:[#allocation2] sm:$0xff] }
  0xb7   :  { %381 = vst.msk [vmem:[#allocation2 + $0x8] sm:$0xff] %vm21_vm1, %v368_v30  ;;  %v714_v44 = vpack.c.bf16 %v702_v40, %v702_v40  ;;  %v90_v30 = vld [vmem:[#allocation2 + $0x28] sm:$0xff] }
  0xb8   :  { %v303_v34 = vpop.f32.mrf.mxu0 }
  0xb9   :  { %v413_v59 = vpop.trf.xlu0  ;;  %727 = vst.msk [vmem:[%s1538_s3] sm:$0xf] %vm726_vm2, %v714_v44 }
  0xba   :  { %992 = vmatmul.msk.bf16.vlgmr.msra.gmra.mxu3 %vm464_vm0, %v413_v59  ;;  %v342_v35 = vpop.f32.mrf.mxu1 }
  0xbb   :  { %v343_v51 = vadd.f32 %v342_v35, %v303_v34 }
  0xbd   :  { %v369_v56 = vadd.f32 %v343_v51, %v87_v50  ;;  %v610_v50 = vld [vmem:[#allocation3 + $0x38] sm:$0xff]  ;;  %v625_v51 = vld [vmem:[#allocation3 + $0xb0] sm:$0xff] }
  0xbe   :  { %v703_v46 = vld [vmem:[#allocation2 + $0x8] sm:$0xff] }
  0xbf   :  { %v715_v49 = vpack.c.bf16 %v703_v46, %v703_v46  ;;  %382 = vst.msk [vmem:[#allocation2 + $0x10] sm:$0xff] %vm21_vm1, %v369_v56 }
  0xc0   :  { %v305_v52 = vpop.f32.mrf.mxu0 }
  0xc1   :  { %v414_v60 = vpop.trf.xlu0  ;;  %728 = vst.msk [vmem:[%s1538_s3 + $0x4] sm:$0xf] %vm726_vm2, %v715_v49 }
  0xc2   :  { %985 = vmatmul.msk.bf16.gmra.mxu2 %vm464_vm0, %v414_v60  ;;  %v344_v53 = vpop.f32.mrf.mxu1  ;;  %v88_v60 = vld [vmem:[#allocation2 + $0x18] sm:$0xff] }
  0xc3   :  { %v345_v57 = vadd.f32 %v344_v53, %v305_v52  ;;  %v91_v53 = vld [vmem:[#allocation2 + $0x30] sm:$0xff] }
  0xc9   :  { %v415_v61 = vpop.trf.xlu0 }
  0xca   :  { %993 = vmatmul.msk.bf16.gmra.mxu3 %vm464_vm0, %v415_v61 }
  0xd1   :  { %v416_v62 = vpop.trf.xlu0 }
  0xd2   :  { %986 = vmatmul.msk.bf16.gmra.mxu2 %vm464_vm0, %v416_v62 }
  0xd9   :  { %v417_v63 = vpop.trf.xlu0 }
  0xda   :  { %994 = vmatmul.msk.bf16.gmra.mxu3 %vm464_vm0, %v417_v63 }
  0xe1   :  { %v418_v0 = vpop.trf.xlu0 }
  0xe2   :  { %987 = vmatmul.msk.bf16.gmra.mxu2 %vm464_vm0, %v418_v0  ;;  %v370_v0 = vadd.f32 %v345_v57, %v88_v60 }
  0xe4   :  { %383 = vst.msk [vmem:[#allocation2 + $0x18] sm:$0xff] %vm21_vm1, %v370_v0  ;;  %v92_v0 = vld [vmem:[#allocation2 + $0x38] sm:$0xff] }
  0xe9   :  { %v419_v1 = vpop.trf.xlu0 }
  0xea   :  { %995 = vmatmul.msk.bf16.gmra.mxu3 %vm464_vm0, %v419_v1 }
  0xeb   :  { %v705_v18 = vld [vmem:[#allocation2 + $0x18] sm:$0xff] }
  0xec   :  { %v717_v21 = vpack.c.bf16 %v705_v18, %v705_v18 }
  0xee   :  { %730 = vst.msk [vmem:[%s1538_s3 + $0xc] sm:$0xf] %vm726_vm2, %v717_v21  ;;  %v627_v21 = vld [vmem:[#allocation3 + $0xc0] sm:$0xff] }
  0xf1   :  { %v420_v2 = vpop.trf.xlu0 }
  0xf2   :  { %988 = vmatmul.msk.bf16.gmra.mxu2 %vm464_vm0, %v420_v2  ;;  %v607_v2 = vld [vmem:[#allocation3 + $0x20] sm:$0xff] }
  0xf9   :  { %v421_v3 = vpop.trf.xlu0 }
  0xfa   :  { %996 = vmatmul.msk.bf16.gmra.mxu3 %vm464_vm0, %v421_v3  ;;  %v622_v3 = vld [vmem:[#allocation3 + $0x98] sm:$0xff] }
 0x101   :  { %v422_v4 = vpop.trf.xlu0 }
 0x102   :  { %989 = vmatmul.msk.bf16.gmra.mxu2 %vm464_vm0, %v422_v4  ;;  %v308_v4 = vpop.f32.mrf.mxu0 }
 0x109   :  { %v423_v5 = vpop.trf.xlu0 }
 0x10a   :  { %997 = vmatmul.msk.bf16.gmra.mxu3 %vm464_vm0, %v423_v5  ;;  %v347_v5 = vpop.f32.mrf.mxu1 }
 0x10b   :  { %v348_v20 = vadd.f32 %v347_v5, %v308_v4 }
 0x111   :  { %v424_v7 = vpop.trf.xlu0 }
 0x112   :  { %990 = vmatmul.msk.bf16.gmra.mxu2 %vm464_vm0, %v424_v7 }
 0x119   :  { %v425_v8 = vpop.trf.xlu0 }
 0x11a   :  { %998 = vmatmul.msk.bf16.gmra.mxu3 %vm464_vm0, %v425_v8 }
 0x121   :  { %v426_v9 = vpop.trf.xlu0 }
 0x122   :  { %991 = vmatmul.msk.bf16.gmra.mxu2 %vm464_vm0, %v426_v9 }
 0x129   :  { %v427_v10 = vpop.trf.xlu0 }
 0x12a   :  { %999 = vmatmul.msk.bf16.gmra.mxu3 %vm464_vm0, %v427_v10  ;;  %v704_v10 = vld [vmem:[#allocation2 + $0x10] sm:$0xff] }
 0x135   :  { %v522_v14 = vpop.f32.mrf.mxu2 }
 0x136   :  { %v635_v15 = vadd.f32 %v603_v11, %v522_v14  ;;  %v716_v14 = vpack.c.bf16 %v704_v10, %v704_v10 }
 0x138   :  { %667 = vst.msk [vmem:[#allocation3] sm:$0xff] %vm21_vm1, %v635_v15 }
 0x139   :  { %729 = vst.msk [vmem:[%s1538_s3 + $0x8] sm:$0xf] %vm726_vm2, %v716_v14 }
 0x13d   :  { %v524_v22 = vpop.f32.mrf.mxu2  ;;  %v562_v23 = vpop.f32.mrf.mxu3 }
 0x13e   :  { %v636_v26 = vadd.f32 %v604_v16, %v524_v22  ;;  %v651_v27 = vadd.f32 %v619_v17, %v562_v23  ;;  %v608_v16 = vld [vmem:[#allocation3 + $0x28] sm:$0xff]  ;;  %v623_v17 = vld [vmem:[#allocation3 + $0xa0] sm:$0xff]  ;;  %v310_v22 = vpop.f32.mrf.mxu0  ;;  %v349_v23 = vpop.f32.mrf.mxu1 }
 0x13f   :  { %v741_v29 = vld [vmem:[#allocation3] sm:$0xff] }
 0x140   :  { %v773_v31 = vpack.c.bf16 %v741_v29, %v741_v29  ;;  %668 = vst.msk [vmem:[#allocation3 + $0x8] sm:$0xff] %vm21_vm1, %v636_v26  ;;  %v371_v26 = vadd.f32 %v348_v20, %v89_v19  ;;  %v612_v20 = vld [vmem:[#allocation3 + $0x48] sm:$0xff] }
 0x141   :  { %683 = vst.msk [vmem:[#allocation3 + $0x80] sm:$0xff] %vm21_vm1, %v651_v27  ;;  %v350_v27 = vadd.f32 %v349_v23, %v310_v22  ;;  %v93_v23 = vld [vmem:[#allocation2 + $0x40] sm:$0xff] }
 0x142   :  { %806 = vst.msk [vmem:[%s1537_s4] sm:$0xf] %vm726_vm2, %v773_v31 }
 0x143   :  { %384 = vst.msk [vmem:[#allocation2 + $0x20] sm:$0xff] %vm21_vm1, %v371_v26  ;;  %v372_v34 = vadd.f32 %v350_v27, %v90_v30 }
 0x145   :  { %v527_v36 = vpop.f32.mrf.mxu2  ;;  %v564_v37 = vpop.f32.mrf.mxu3  ;;  %385 = vst.msk [vmem:[#allocation2 + $0x28] sm:$0xff] %vm21_vm1, %v372_v34  ;;  %v94_v34 = vld [vmem:[#allocation2 + $0x48] sm:$0xff] }
 0x146   :  { %v637_v38 = vadd.f32 %v605_v32, %v527_v36  ;;  %v652_v39 = vadd.f32 %v620_v33, %v564_v37  ;;  %v609_v36 = vld [vmem:[#allocation3 + $0x30] sm:$0xff]  ;;  %v624_v37 = vld [vmem:[#allocation3 + $0xa8] sm:$0xff] }
 0x147   :  { %v742_v41 = vld [vmem:[#allocation3 + $0x8] sm:$0xff] }
 0x148   :  { %v774_v42 = vpack.c.bf16 %v742_v41, %v742_v41  ;;  %v757_v43 = vld [vmem:[#allocation3 + $0x80] sm:$0xff]  ;;  %669 = vst.msk [vmem:[#allocation3 + $0x10] sm:$0xff] %vm21_vm1, %v637_v38  ;;  %v313_v38 = vpop.f32.mrf.mxu0 }
 0x149   :  { %v789_v45 = vpack.c.bf16 %v757_v43, %v757_v43  ;;  %684 = vst.msk [vmem:[#allocation3 + $0x88] sm:$0xff] %vm21_vm1, %v652_v39  ;;  %v352_v39 = vpop.f32.mrf.mxu1 }
 0x14a   :  { %807 = vst.msk [vmem:[%s1537_s4 + $0x4] sm:$0xf] %vm726_vm2, %v774_v42  ;;  %v706_v44 = vld [vmem:[#allocation2 + $0x20] sm:$0xff] }
 0x14b   :  { %822 = vst.msk [vmem:[%s1537_s4 + $0x40] sm:$0xf] %vm726_vm2, %v789_v45 }
 0x14c   :  { %v707_v52 = vld [vmem:[#allocation2 + $0x28] sm:$0xff] }
 0x14d   :  { %v529_v54 = vpop.f32.mrf.mxu2  ;;  %v567_v55 = vpop.f32.mrf.mxu3 }
 0x14e   :  { %v638_v58 = vadd.f32 %v606_v47, %v529_v54  ;;  %v653_v59 = vadd.f32 %v621_v48, %v567_v55  ;;  %v718_v48 = vpack.c.bf16 %v706_v44, %v706_v44  ;;  %v353_v54 = vadd.f32 %v352_v39, %v313_v38 }
 0x14f   :  { %v743_v61 = vld [vmem:[#allocation3 + $0x10] sm:$0xff]  ;;  %v719_v55 = vpack.c.bf16 %v707_v52, %v707_v52 }
 0x150   :  { %v775_v62 = vpack.c.bf16 %v743_v61, %v743_v61  ;;  %v758_v63 = vld [vmem:[#allocation3 + $0x88] sm:$0xff]  ;;  %670 = vst.msk [vmem:[#allocation3 + $0x18] sm:$0xff] %vm21_vm1, %v638_v58  ;;  %v315_v56 = vpop.f32.mrf.mxu0  ;;  %v373_v60 = vadd.f32 %v353_v54, %v91_v53  ;;  %v614_v54 = vld [vmem:[#allocation3 + $0x58] sm:$0xff] }
 0x151   :  { %v790_v1 = vpack.c.bf16 %v758_v63, %v758_v63  ;;  %685 = vst.msk [vmem:[#allocation3 + $0x90] sm:$0xff] %vm21_vm1, %v653_v59  ;;  %v354_v57 = vpop.f32.mrf.mxu1 }
 0x152   :  { %808 = vst.msk [vmem:[%s1537_s4 + $0x8] sm:$0xf] %vm726_vm2, %v775_v62  ;;  %v355_v61 = vadd.f32 %v354_v57, %v315_v56  ;;  %v95_v57 = vld [vmem:[#allocation2 + $0x50] sm:$0xff] }
 0x153   :  { %823 = vst.msk [vmem:[%s1537_s4 + $0x44] sm:$0xf] %vm726_vm2, %v790_v1 }
 0x154   :  { %731 = vst.msk [vmem:[%s1538_s3 + $0x10] sm:$0xf] %vm726_vm2, %v718_v48  ;;  %v374_v4 = vadd.f32 %v355_v61, %v92_v0 }
 0x155   :  { %v532_v6 = vpop.f32.mrf.mxu2  ;;  %v569_v7 = vpop.f32.mrf.mxu3  ;;  %732 = vst.msk [vmem:[%s1538_s3 + $0x14] sm:$0xf] %vm726_vm2, %v719_v55  ;;  %v629_v55 = vld [vmem:[#allocation3 + $0xd0] sm:$0xff] }
 0x156   :  { %v639_v8 = vadd.f32 %v607_v2, %v532_v6  ;;  %v654_v9 = vadd.f32 %v622_v3, %v569_v7  ;;  %386 = vst.msk [vmem:[#allocation2 + $0x30] sm:$0xff] %vm21_vm1, %v373_v60  ;;  %v611_v6 = vld [vmem:[#allocation3 + $0x40] sm:$0xff]  ;;  %v626_v7 = vld [vmem:[#allocation3 + $0xb8] sm:$0xff] }
 0x157   :  { %v744_v11 = vld [vmem:[#allocation3 + $0x18] sm:$0xff]  ;;  %387 = vst.msk [vmem:[#allocation2 + $0x38] sm:$0xff] %vm21_vm1, %v374_v4 }
 0x158   :  { %v776_v12 = vpack.c.bf16 %v744_v11, %v744_v11  ;;  %v759_v13 = vld [vmem:[#allocation3 + $0x90] sm:$0xff]  ;;  %671 = vst.msk [vmem:[#allocation3 + $0x20] sm:$0xff] %vm21_vm1, %v639_v8  ;;  %v318_v8 = vpop.f32.mrf.mxu0  ;;  %v96_v4 = vld [vmem:[#allocation2 + $0x58] sm:$0xff] }
 0x159   :  { %v791_v15 = vpack.c.bf16 %v759_v13, %v759_v13  ;;  %686 = vst.msk [vmem:[#allocation3 + $0x98] sm:$0xff] %vm21_vm1, %v654_v9  ;;  %v357_v9 = vpop.f32.mrf.mxu1 }
 0x15a   :  { %809 = vst.msk [vmem:[%s1537_s4 + $0xc] sm:$0xf] %vm726_vm2, %v776_v12 }
 0x15b   :  { %824 = vst.msk [vmem:[%s1537_s4 + $0x48] sm:$0xf] %vm726_vm2, %v791_v15 }
 0x15d   :  { %v534_v24 = vpop.f32.mrf.mxu2  ;;  %v572_v25 = vpop.f32.mrf.mxu3  ;;  %v708_v14 = vld [vmem:[#allocation2 + $0x30] sm:$0xff] }
 0x15e   :  { %v640_v28 = vadd.f32 %v608_v16, %v534_v24  ;;  %v655_v29 = vadd.f32 %v623_v17, %v572_v25  ;;  %v720_v18 = vpack.c.bf16 %v708_v14, %v708_v14  ;;  %v709_v22 = vld [vmem:[#allocation2 + $0x38] sm:$0xff]  ;;  %v358_v24 = vadd.f32 %v357_v9, %v318_v8 }
 0x15f   :  { %v745_v31 = vld [vmem:[#allocation3 + $0x20] sm:$0xff]  ;;  %v721_v25 = vpack.c.bf16 %v709_v22, %v709_v22  ;;  %v616_v22 = vld [vmem:[#allocation3 + $0x68] sm:$0xff] }
 0x160   :  { %v777_v32 = vpack.c.bf16 %v745_v31, %v745_v31  ;;  %v760_v33 = vld [vmem:[#allocation3 + $0x98] sm:$0xff]  ;;  %672 = vst.msk [vmem:[#allocation3 + $0x28] sm:$0xff] %vm21_vm1, %v640_v28  ;;  %v320_v26 = vpop.f32.mrf.mxu0  ;;  %v375_v30 = vadd.f32 %v358_v24, %v93_v23  ;;  %v631_v23 = vld [vmem:[#allocation3 + $0xe0] sm:$0xff] }
 0x161   :  { %v792_v35 = vpack.c.bf16 %v760_v33, %v760_v33  ;;  %687 = vst.msk [vmem:[#allocation3 + $0xa0] sm:$0xff] %vm21_vm1, %v655_v29  ;;  %v359_v27 = vpop.f32.mrf.mxu1 }
 0x162   :  { %810 = vst.msk [vmem:[%s1537_s4 + $0x10] sm:$0xf] %vm726_vm2, %v777_v32  ;;  %v360_v31 = vadd.f32 %v359_v27, %v320_v26 }
 0x163   :  { %825 = vst.msk [vmem:[%s1537_s4 + $0x4c] sm:$0xf] %vm726_vm2, %v792_v35 }
 0x164   :  { %733 = vst.msk [vmem:[%s1538_s3 + $0x18] sm:$0xf] %vm726_vm2, %v720_v18  ;;  %v376_v38 = vadd.f32 %v360_v31, %v94_v34  ;;  %v617_v34 = vld [vmem:[#allocation3 + $0x70] sm:$0xff] }
 0x165   :  { %v537_v40 = vpop.f32.mrf.mxu2  ;;  %v574_v41 = vpop.f32.mrf.mxu3  ;;  %734 = vst.msk [vmem:[%s1538_s3 + $0x1c] sm:$0xf] %vm726_vm2, %v721_v25 }
 0x166   :  { %v641_v42 = vadd.f32 %v609_v36, %v537_v40  ;;  %v656_v43 = vadd.f32 %v624_v37, %v574_v41  ;;  %388 = vst.msk [vmem:[#allocation2 + $0x40] sm:$0xff] %vm21_vm1, %v375_v30  ;;  %v613_v40 = vld [vmem:[#allocation3 + $0x50] sm:$0xff]  ;;  %v628_v41 = vld [vmem:[#allocation3 + $0xc8] sm:$0xff] }
 0x167   :  { %v746_v45 = vld [vmem:[#allocation3 + $0x28] sm:$0xff]  ;;  %389 = vst.msk [vmem:[#allocation2 + $0x48] sm:$0xff] %vm21_vm1, %v376_v38 }
 0x168   :  { %v778_v46 = vpack.c.bf16 %v746_v45, %v746_v45  ;;  %v761_v47 = vld [vmem:[#allocation3 + $0xa0] sm:$0xff]  ;;  %673 = vst.msk [vmem:[#allocation3 + $0x30] sm:$0xff] %vm21_vm1, %v641_v42  ;;  %v323_v42 = vpop.f32.mrf.mxu0 }
 0x169   :  { %v793_v49 = vpack.c.bf16 %v761_v47, %v761_v47  ;;  %688 = vst.msk [vmem:[#allocation3 + $0xa8] sm:$0xff] %vm21_vm1, %v656_v43  ;;  %v362_v43 = vpop.f32.mrf.mxu1 }
 0x16a   :  { %811 = vst.msk [vmem:[%s1537_s4 + $0x14] sm:$0xf] %vm726_vm2, %v778_v46 }
 0x16b   :  { %826 = vst.msk [vmem:[%s1537_s4 + $0x50] sm:$0xf] %vm726_vm2, %v793_v49 }
 0x16d   :  { %v539_v58 = vpop.f32.mrf.mxu2  ;;  %v577_v59 = vpop.f32.mrf.mxu3  ;;  %v710_v48 = vld [vmem:[#allocation2 + $0x40] sm:$0xff] }
 0x16e   :  { %v642_v62 = vadd.f32 %v610_v50, %v539_v58  ;;  %v657_v63 = vadd.f32 %v625_v51, %v577_v59  ;;  %v722_v52 = vpack.c.bf16 %v710_v48, %v710_v48  ;;  %v711_v56 = vld [vmem:[#allocation2 + $0x48] sm:$0xff]  ;;  %v363_v58 = vadd.f32 %v362_v43, %v323_v42 }
 0x16f   :  { %v747_v1 = vld [vmem:[#allocation3 + $0x30] sm:$0xff]  ;;  %v723_v59 = vpack.c.bf16 %v711_v56, %v711_v56 }
 0x170   :  { %v779_v2 = vpack.c.bf16 %v747_v1, %v747_v1  ;;  %v762_v3 = vld [vmem:[#allocation3 + $0xa8] sm:$0xff]  ;;  %674 = vst.msk [vmem:[#allocation3 + $0x38] sm:$0xff] %vm21_vm1, %v642_v62  ;;  %v325_v60 = vpop.f32.mrf.mxu0  ;;  %v377_v0 = vadd.f32 %v363_v58, %v95_v57 }
 0x171   :  { %v794_v5 = vpack.c.bf16 %v762_v3, %v762_v3  ;;  %689 = vst.msk [vmem:[#allocation3 + $0xb0] sm:$0xff] %vm21_vm1, %v657_v63  ;;  %v364_v61 = vpop.f32.mrf.mxu1 }
 0x172   :  { %812 = vst.msk [vmem:[%s1537_s4 + $0x18] sm:$0xf] %vm726_vm2, %v779_v2  ;;  %v365_v1 = vadd.f32 %v364_v61, %v325_v60 }
 0x173   :  { %827 = vst.msk [vmem:[%s1537_s4 + $0x54] sm:$0xf] %vm726_vm2, %v794_v5 }
 0x174   :  { %735 = vst.msk [vmem:[%s1538_s3 + $0x20] sm:$0xf] %vm726_vm2, %v722_v52  ;;  %v378_v8 = vadd.f32 %v365_v1, %v96_v4 }
 0x175   :  { %v542_v10 = vpop.f32.mrf.mxu2  ;;  %v579_v11 = vpop.f32.mrf.mxu3  ;;  %736 = vst.msk [vmem:[%s1538_s3 + $0x24] sm:$0xf] %vm726_vm2, %v723_v59 }
 0x176   :  { %v643_v12 = vadd.f32 %v611_v6, %v542_v10  ;;  %v658_v13 = vadd.f32 %v626_v7, %v579_v11  ;;  %390 = vst.msk [vmem:[#allocation2 + $0x50] sm:$0xff] %vm21_vm1, %v377_v0  ;;  %v615_v10 = vld [vmem:[#allocation3 + $0x60] sm:$0xff]  ;;  %v630_v11 = vld [vmem:[#allocation3 + $0xd8] sm:$0xff] }
 0x177   :  { %v748_v15 = vld [vmem:[#allocation3 + $0x38] sm:$0xff]  ;;  %391 = vst.msk [vmem:[#allocation2 + $0x58] sm:$0xff] %vm21_vm1, %v378_v8 }
 0x178   :  { %v780_v16 = vpack.c.bf16 %v748_v15, %v748_v15  ;;  %v763_v17 = vld [vmem:[#allocation3 + $0xb0] sm:$0xff]  ;;  %675 = vst.msk [vmem:[#allocation3 + $0x40] sm:$0xff] %vm21_vm1, %v643_v12 }
 0x179   :  { %v795_v19 = vpack.c.bf16 %v763_v17, %v763_v17  ;;  %690 = vst.msk [vmem:[#allocation3 + $0xb8] sm:$0xff] %vm21_vm1, %v658_v13 }
 0x17a   :  { %813 = vst.msk [vmem:[%s1537_s4 + $0x1c] sm:$0xf] %vm726_vm2, %v780_v16 }
 0x17b   :  { %828 = vst.msk [vmem:[%s1537_s4 + $0x58] sm:$0xf] %vm726_vm2, %v795_v19 }
 0x17d   :  { %v544_v28 = vpop.f32.mrf.mxu2  ;;  %v582_v29 = vpop.f32.mrf.mxu3  ;;  %v712_v16 = vld [vmem:[#allocation2 + $0x50] sm:$0xff] }
 0x17e   :  { %v644_v32 = vadd.f32 %v612_v20, %v544_v28  ;;  %v659_v33 = vadd.f32 %v627_v21, %v582_v29  ;;  %v724_v20 = vpack.c.bf16 %v712_v16, %v712_v16  ;;  %v713_v24 = vld [vmem:[#allocation2 + $0x58] sm:$0xff] }
 0x17f   :  { %v749_v35 = vld [vmem:[#allocation3 + $0x40] sm:$0xff]  ;;  %v725_v25 = vpack.c.bf16 %v713_v24, %v713_v24 }
 0x180   :  { %v781_v36 = vpack.c.bf16 %v749_v35, %v749_v35  ;;  %v764_v37 = vld [vmem:[#allocation3 + $0xb8] sm:$0xff]  ;;  %676 = vst.msk [vmem:[#allocation3 + $0x48] sm:$0xff] %vm21_vm1, %v644_v32  ;;  %v632_v35 = vld [vmem:[#allocation3 + $0xe8] sm:$0xff] }
 0x181   :  { %v796_v39 = vpack.c.bf16 %v764_v37, %v764_v37  ;;  %691 = vst.msk [vmem:[#allocation3 + $0xc0] sm:$0xff] %vm21_vm1, %v659_v33 }
 0x182   :  { %814 = vst.msk [vmem:[%s1537_s4 + $0x20] sm:$0xf] %vm726_vm2, %v781_v36 }
 0x183   :  { %829 = vst.msk [vmem:[%s1537_s4 + $0x5c] sm:$0xf] %vm726_vm2, %v796_v39 }
 0x184   :  { %737 = vst.msk [vmem:[%s1538_s3 + $0x28] sm:$0xf] %vm726_vm2, %v724_v20 }
 0x185   :  { %v547_v44 = vpop.f32.mrf.mxu2  ;;  %v584_v45 = vpop.f32.mrf.mxu3  ;;  %738 = vst.msk [vmem:[%s1538_s3 + $0x2c] sm:$0xf] %vm726_vm2, %v725_v25 }
 0x186   :  { %v645_v46 = vadd.f32 %v613_v40, %v547_v44  ;;  %v660_v47 = vadd.f32 %v628_v41, %v584_v45  ;;  %v618_v44 = vld [vmem:[#allocation3 + $0x78] sm:$0xff]  ;;  %v633_v45 = vld [vmem:[#allocation3 + $0xf0] sm:$0xff] }
 0x187   :  { %v750_v49 = vld [vmem:[#allocation3 + $0x48] sm:$0xff] }
 0x188   :  { %v782_v50 = vpack.c.bf16 %v750_v49, %v750_v49  ;;  %v765_v51 = vld [vmem:[#allocation3 + $0xc0] sm:$0xff]  ;;  %677 = vst.msk [vmem:[#allocation3 + $0x50] sm:$0xff] %vm21_vm1, %v645_v46 }
 0x189   :  { %v797_v53 = vpack.c.bf16 %v765_v51, %v765_v51  ;;  %692 = vst.msk [vmem:[#allocation3 + $0xc8] sm:$0xff] %vm21_vm1, %v660_v47 }
 0x18a   :  { %815 = vst.msk [vmem:[%s1537_s4 + $0x24] sm:$0xf] %vm726_vm2, %v782_v50 }
 0x18b   :  { %830 = vst.msk [vmem:[%s1537_s4 + $0x60] sm:$0xf] %vm726_vm2, %v797_v53 }
 0x18d   :  { %v549_v62 = vpop.f32.mrf.mxu2  ;;  %v587_v63 = vpop.f32.mrf.mxu3 }
 0x18e   :  { %v646_v2 = vadd.f32 %v614_v54, %v549_v62  ;;  %v661_v3 = vadd.f32 %v629_v55, %v587_v63  ;;  %v634_v54 = vld [vmem:[#allocation3 + $0xf8] sm:$0xff] }
 0x18f   :  { %v751_v5 = vld [vmem:[#allocation3 + $0x50] sm:$0xff] }
 0x190   :  { %v783_v6 = vpack.c.bf16 %v751_v5, %v751_v5  ;;  %v766_v7 = vld [vmem:[#allocation3 + $0xc8] sm:$0xff]  ;;  %678 = vst.msk [vmem:[#allocation3 + $0x58] sm:$0xff] %vm21_vm1, %v646_v2 }
 0x191   :  { %v798_v9 = vpack.c.bf16 %v766_v7, %v766_v7  ;;  %693 = vst.msk [vmem:[#allocation3 + $0xd0] sm:$0xff] %vm21_vm1, %v661_v3 }
 0x192   :  { %816 = vst.msk [vmem:[%s1537_s4 + $0x28] sm:$0xf] %vm726_vm2, %v783_v6 }
 0x193   :  { %831 = vst.msk [vmem:[%s1537_s4 + $0x64] sm:$0xf] %vm726_vm2, %v798_v9 }
 0x195   :  { %v552_v12 = vpop.f32.mrf.mxu2  ;;  %v589_v13 = vpop.f32.mrf.mxu3 }
 0x196   :  { %v647_v14 = vadd.f32 %v615_v10, %v552_v12  ;;  %v662_v15 = vadd.f32 %v630_v11, %v589_v13 }
 0x197   :  { %v752_v17 = vld [vmem:[#allocation3 + $0x58] sm:$0xff] }
 0x198   :  { %v784_v18 = vpack.c.bf16 %v752_v17, %v752_v17  ;;  %v767_v19 = vld [vmem:[#allocation3 + $0xd0] sm:$0xff]  ;;  %679 = vst.msk [vmem:[#allocation3 + $0x60] sm:$0xff] %vm21_vm1, %v647_v14 }
 0x199   :  { %v799_v21 = vpack.c.bf16 %v767_v19, %v767_v19  ;;  %694 = vst.msk [vmem:[#allocation3 + $0xd8] sm:$0xff] %vm21_vm1, %v662_v15 }
 0x19a   :  { %817 = vst.msk [vmem:[%s1537_s4 + $0x2c] sm:$0xf] %vm726_vm2, %v784_v18 }
 0x19b   :  { %832 = vst.msk [vmem:[%s1537_s4 + $0x68] sm:$0xf] %vm726_vm2, %v799_v21 }
 0x19d   :  { %v554_v26 = vpop.f32.mrf.mxu2  ;;  %v592_v27 = vpop.f32.mrf.mxu3 }
 0x19e   :  { %v648_v28 = vadd.f32 %v616_v22, %v554_v26  ;;  %v663_v29 = vadd.f32 %v631_v23, %v592_v27 }
 0x19f   :  { %v753_v30 = vld [vmem:[#allocation3 + $0x60] sm:$0xff] }
 0x1a0   :  { %v785_v31 = vpack.c.bf16 %v753_v30, %v753_v30  ;;  %v768_v32 = vld [vmem:[#allocation3 + $0xd8] sm:$0xff]  ;;  %680 = vst.msk [vmem:[#allocation3 + $0x68] sm:$0xff] %vm21_vm1, %v648_v28 }
 0x1a1   :  { %v800_v33 = vpack.c.bf16 %v768_v32, %v768_v32  ;;  %695 = vst.msk [vmem:[#allocation3 + $0xe0] sm:$0xff] %vm21_vm1, %v663_v29 }
 0x1a2   :  { %818 = vst.msk [vmem:[%s1537_s4 + $0x30] sm:$0xf] %vm726_vm2, %v785_v31 }
 0x1a3   :  { %833 = vst.msk [vmem:[%s1537_s4 + $0x6c] sm:$0xf] %vm726_vm2, %v800_v33 }
 0x1a5   :  { %v557_v36 = vpop.f32.mrf.mxu2  ;;  %v594_v37 = vpop.f32.mrf.mxu3 }
 0x1a6   :  { %v649_v38 = vadd.f32 %v617_v34, %v557_v36  ;;  %v664_v39 = vadd.f32 %v632_v35, %v594_v37 }
 0x1a7   :  { %v754_v40 = vld [vmem:[#allocation3 + $0x68] sm:$0xff] }
 0x1a8   :  { %v786_v41 = vpack.c.bf16 %v754_v40, %v754_v40  ;;  %v769_v42 = vld [vmem:[#allocation3 + $0xe0] sm:$0xff]  ;;  %681 = vst.msk [vmem:[#allocation3 + $0x70] sm:$0xff] %vm21_vm1, %v649_v38 }
 0x1a9   :  { %v801_v43 = vpack.c.bf16 %v769_v42, %v769_v42  ;;  %696 = vst.msk [vmem:[#allocation3 + $0xe8] sm:$0xff] %vm21_vm1, %v664_v39 }
 0x1aa   :  { %819 = vst.msk [vmem:[%s1537_s4 + $0x34] sm:$0xf] %vm726_vm2, %v786_v41 }
 0x1ab   :  { %834 = vst.msk [vmem:[%s1537_s4 + $0x70] sm:$0xf] %vm726_vm2, %v801_v43 }
 0x1ad   :  { %v559_v46 = vpop.f32.mrf.mxu2  ;;  %v597_v47 = vpop.f32.mrf.mxu3 }
 0x1ae   :  { %v650_v48 = vadd.f32 %v618_v44, %v559_v46  ;;  %v665_v49 = vadd.f32 %v633_v45, %v597_v47 }
 0x1af   :  { %v755_v50 = vld [vmem:[#allocation3 + $0x70] sm:$0xff] }
 0x1b0   :  { %v787_v51 = vpack.c.bf16 %v755_v50, %v755_v50  ;;  %v770_v52 = vld [vmem:[#allocation3 + $0xe8] sm:$0xff]  ;;  %682 = vst.msk [vmem:[#allocation3 + $0x78] sm:$0xff] %vm21_vm1, %v650_v48 }
 0x1b1   :  { %v802_v53 = vpack.c.bf16 %v770_v52, %v770_v52  ;;  %697 = vst.msk [vmem:[#allocation3 + $0xf0] sm:$0xff] %vm21_vm1, %v665_v49 }
 0x1b2   :  { %820 = vst.msk [vmem:[%s1537_s4 + $0x38] sm:$0xf] %vm726_vm2, %v787_v51 }
 0x1b3   :  { %835 = vst.msk [vmem:[%s1537_s4 + $0x74] sm:$0xf] %vm726_vm2, %v802_v53 }
 0x1b5   :  { %v599_v55 = vpop.f32.mrf.mxu3 }
 0x1b6   :  { %v666_v56 = vadd.f32 %v634_v54, %v599_v55 }
 0x1b7   :  { %v756_v57 = vld [vmem:[#allocation3 + $0x78] sm:$0xff] }
 0x1b8   :  { %v788_v58 = vpack.c.bf16 %v756_v57, %v756_v57  ;;  %v771_v59 = vld [vmem:[#allocation3 + $0xf0] sm:$0xff]  ;;  %698 = vst.msk [vmem:[#allocation3 + $0xf8] sm:$0xff] %vm21_vm1, %v666_v56 }
 0x1b9   :  { %v803_v60 = vpack.c.bf16 %v771_v59, %v771_v59 }
 0x1ba   :  { %821 = vst.msk [vmem:[%s1537_s4 + $0x3c] sm:$0xf] %vm726_vm2, %v788_v58 }
 0x1bb   :  { %836 = vst.msk [vmem:[%s1537_s4 + $0x78] sm:$0xf] %vm726_vm2, %v803_v60 }
 0x1bf   :  { %v772_v61 = vld [vmem:[#allocation3 + $0xf8] sm:$0xff] }
 0x1c0   :  { %v804_v62 = vpack.c.bf16 %v772_v61, %v772_v61 }
 0x1c2   :  { %837 = vst.msk [vmem:[%s1537_s4 + $0x7c] sm:$0xf] %vm726_vm2, %v804_v62 }

</bundles_post_ra>
